<compile_context>
chip_gen: v6e
topology: v6e:2x2x1
jax: 0.10.0
libtpu: 0.0.40
codegen_flags: <defaults>
</compile_context>

<pallas_src>
import functools

import jax
import jax.numpy as jnp
from jax import lax
from jax.experimental import pallas as pl
from jax.experimental.pallas import tpu as pltpu


# ---------------------------------------------------------------------------
# Fused kernel: per-pixel NLL (logsumexp - true-class logit), 0 for ignored.
# ---------------------------------------------------------------------------
def _ohem_nll_kernel(x_ref, t_ref, nll_ref, *, n_classes, ignore_index,
                     sub_rows):
    # x_ref: (C, TH, LW) logits (native dtype), t_ref: (TH, LW) int32,
    # nll_ref: (TH, LW) float32.  Batch dim is squeezed out by the BlockSpec.
    th = t_ref.shape[0]

    def process_chunk(r0, rows):
        # One vreg-sized pixel chunk: all accumulators live in registers.
        rs = pl.ds(r0, rows)
        t = t_ref[rs, :]                          # (rows, LW) int32
        valid = t != ignore_index
        tc = jnp.where(valid, t, 0)               # clamp ignored labels to 0

        # ---- pass 1: running max over classes, in the native logits dtype.
        def max_body(ci, m):
            return jnp.maximum(m, x_ref[ci, rs, :])

        m = x_ref[0, rs, :]
        if n_classes > 1:
            if n_classes <= 32:
                for ci in range(1, n_classes):
                    m = max_body(ci, m)
            else:
                m = lax.fori_loop(1, n_classes, max_body, m, unroll=8)
        m = m.astype(jnp.float32)                 # single cast after the loop

        # ---- pass 2: exp-sum (logsumexp) + one-hot SELECT of true logit.
        def sum_body(ci, carry):
            denom, logit_t = carry
            xi = x_ref[ci, rs, :].astype(jnp.float32)
            denom = denom + jnp.exp(xi - m)
            logit_t = jnp.where(tc == ci, xi, logit_t)   # select, no add
            return denom, logit_t

        denom = jnp.zeros_like(m)
        logit_t = jnp.zeros_like(m)
        if n_classes <= 32:
            for ci in range(n_classes):
                denom, logit_t = sum_body(ci, (denom, logit_t))
        else:
            denom, logit_t = lax.fori_loop(0, n_classes, sum_body,
                                           (denom, logit_t), unroll=8)

        nll = jnp.log(denom) + m - logit_t        # logsumexp - true-class logit
        nll_ref[rs, :] = jnp.where(valid, nll, 0.0)

    n_full, rem = divmod(th, sub_rows)
    if n_full > 0:
        @pl.loop(0, n_full)
        def _(r):
            process_chunk(pl.multiple_of(r * sub_rows, sub_rows), sub_rows)
    if rem > 0:
        process_chunk(n_full * sub_rows, rem)


# ---------------------------------------------------------------------------
# Generation-aware tile sizing
# ---------------------------------------------------------------------------
def _vmem_budget_bytes():
    """Returns (pipelined working-set budget, vmem_limit_bytes)."""
    vmem_cap = None
    try:
        info = pltpu.get_tpu_info()
        vmem_cap = getattr(info, "vmem_capacity_bytes", None)
    except Exception:
        vmem_cap = None
    if vmem_cap is None:
        vmem_cap = 64 * 1024 * 1024               # conservative (v7x-class)
    if vmem_cap >= 100 * 1024 * 1024:             # v5e / v6e: 128 MiB physical
        return 32 * 1024 * 1024, 80 * 1024 * 1024
    # v7x-class: 64 MiB physical, 32 MiB default scoped limit.
    return 18 * 1024 * 1024, 32 * 1024 * 1024


# ---------------------------------------------------------------------------
# pallas_call wrapper: one fused streaming pass over the logits
# ---------------------------------------------------------------------------
def _per_pixel_nll(pred, target, *, ignore_index):
    n, c, h, w = pred.shape
    p = h * w
    x = pred.reshape(n, c, p)
    t = target.astype(jnp.int32).reshape(n, p)

    # Pad the flat pixel axis to a multiple of 128 only when needed.  Padded
    # pixels carry ignore_index so they never contribute; they are sliced off
    # below.  (Common segmentation frames are already 128-divisible -> no copy.)
    p_pad = p
    if p % 128 != 0:
        p_pad = ((p + 127) // 128) * 128
        x = jnp.pad(x, ((0, 0), (0, 0), (0, p_pad - p)))
        t = jnp.pad(t, ((0, 0), (0, p_pad - p)), constant_values=ignore_index)

    # Fold pixels into (rows, LW) with a 128-aligned lane width: lane-dense
    # unmasked output stores + one contiguous DMA per class per block.
    lw = 512 if p_pad % 512 == 0 else (256 if p_pad % 256 == 0 else 128)
    rows = p_pad // lw
    x = x.reshape(n, c, rows, lw)
    t = t.reshape(n, rows, lw)

    x_bytes = jnp.dtype(pred.dtype).itemsize
    sub_rows = max(8, 4096 // lw)                 # ~4 vregs per f32 chunk value
    # Sub-32-bit logits pack along sublanes -> keep TH 16-aligned for bf16,
    # 32-aligned for int8/fp8.
    row_align = max(sub_rows, max(8, 32 // x_bytes))

    budget, vmem_limit = _vmem_budget_bytes()
    # Per-row bytes of the whole double-buffered working set:
    # logits tile + target tile + nll output tile.
    per_row = lw * (c * x_bytes * 2 + 4 * 2 + 4 * 2)
    th = max(1, budget // per_row)
    if th >= rows:
        th = rows                                 # full-extent block (always legal)
    else:
        th = max(row_align, (th // row_align) * row_align)

    grid = (pl.cdiv(rows, th), n)                 # many-step axis first (megacore)

    kernel = functools.partial(_ohem_nll_kernel, n_classes=c,
                               ignore_index=ignore_index, sub_rows=sub_rows)
    nll = pl.pallas_call(
        kernel,
        out_shape=jax.ShapeDtypeStruct((n, rows, lw), jnp.float32),
        grid_spec=pltpu.PrefetchScalarGridSpec(
            num_scalar_prefetch=0,
            grid=grid,
            in_specs=[pl.BlockSpec((None, c, th, lw), lambda i, b: (b, 0, i, 0)),
                      pl.BlockSpec((None, th, lw), lambda i, b: (b, i, 0))],
            out_specs=pl.BlockSpec((None, th, lw), lambda i, b: (b, i, 0))),
        compiler_params=pltpu.CompilerParams(
            dimension_semantics=("parallel", "parallel"),
            vmem_limit_bytes=vmem_limit),
    )(x, t)

    return nll.reshape(n, p_pad)[:, :p]           # (N, H*W) float32


# ---------------------------------------------------------------------------
# OhemCrossEntropy2d.forward
# ---------------------------------------------------------------------------
def ohem_cross_entropy_2d(pred, target, *, ignore_index=-1, thresh=0.7,
                          min_kept=100000):
    n, c, h, w = pred.shape
    n_pix = n * h * w

    nll = _per_pixel_nll(pred, target, ignore_index=ignore_index).reshape(n_pix)
    t = target.reshape(n_pix).astype(jnp.int32)
    valid = t != ignore_index

    # OHEM ranking score = softmax prob of the true class with ignored pixels
    # forced to 1 (PyTorch masked_fill_).  Reconstructed from the NLL so the
    # kernel only writes one per-pixel output: exp(-0) == 1 for ignored pixels.
    mask_prob = jnp.exp(-nll)

    num_valid = jnp.sum(valid.astype(jnp.int32))
    # PyTorch applies OHEM only when min_kept <= num_valid and num_valid > 0.
    use_ohem = jnp.logical_and(num_valid >= min_kept, num_valid > 0)
    thresh_f = jnp.float32(thresh)

    if min_kept > 0:
        k = min(n_pix, int(min_kept)) - 1

        def _ohem_mask():
            # TODO(synk): replace the full sort with a streaming histogram /
            # radix rank-k select (ideally per-tile histograms fused into the
            # main kernel).  The exact sort is kept here to match PyTorch's
            # argsort-based threshold selection.
            kth = jnp.sort(mask_prob)[k]
            threshold = jnp.maximum(kth, thresh_f)
            return jnp.logical_and(valid, mask_prob <= threshold)

        def _plain_mask():
            return valid

        # lax.cond: the sort only executes when the OHEM branch is live.
        final_valid = lax.cond(use_ohem, _ohem_mask, _plain_mask)
    else:
        kept = mask_prob <= thresh_f
        final_valid = jnp.where(use_ohem, jnp.logical_and(valid, kept), valid)

    # nn.CrossEntropyLoss(ignore_index=...): mean NLL over kept pixels.
    loss_sum = jnp.sum(jnp.where(final_valid, nll, 0.0))
    count = jnp.sum(final_valid)                   # integer count (exact)
    return loss_sum / count.astype(jnp.float32)    # NaN if nothing kept (matches torch)


# ---------------------------------------------------------------------------
# MixSoftmaxCrossEntropyOHEMLoss.forward
# ---------------------------------------------------------------------------
def mix_softmax_ce_ohem_loss(preds, target, *, aux=False, aux_weight=0.4,
                             ignore_index=-1, thresh=0.7, min_kept=100000):
    if not isinstance(preds, (list, tuple)):
        preds = (preds,)
    loss = ohem_cross_entropy_2d(preds[0], target, ignore_index=ignore_index,
                                 thresh=thresh, min_kept=min_kept)
    if aux:
        for p in preds[1:]:
            loss = loss + aux_weight * ohem_cross_entropy_2d(
                p, target, ignore_index=ignore_index, thresh=thresh,
                min_kept=min_kept)
    return dict(loss=loss)


# ---------------------------------------------------------------------------
# Pure-JAX reference (same semantics), for a sanity check
# ---------------------------------------------------------------------------
def _ref_ohem_loss(pred, target, *, ignore_index=-1, thresh=0.7, min_kept=100000):
    n, c, h, w = pred.shape
    x = jnp.transpose(pred, (0, 2, 3, 1)).reshape(-1, c).astype(jnp.float32)
    t = target.reshape(-1).astype(jnp.int32)
    valid = t != ignore_index
    num_valid = jnp.sum(valid.astype(jnp.int32))
    logp = jax.nn.log_softmax(x, axis=-1)
    prob = jnp.exp(logp)
    tc = jnp.where(valid, t, 0)
    mask_prob = jnp.where(valid,
                          jnp.take_along_axis(prob, tc[:, None], axis=1)[:, 0],
                          1.0)
    if min_kept > 0:
        sp = jnp.sort(mask_prob)
        k = min(mask_prob.shape[0], min_kept) - 1
        threshold = jnp.maximum(sp[k], jnp.float32(thresh))
    else:
        threshold = jnp.float32(thresh)
    use_ohem = jnp.logical_and(num_valid >= min_kept, num_valid > 0)
    fvalid = jnp.where(use_ohem, jnp.logical_and(valid, mask_prob <= threshold),
                       valid)
    nll = -jnp.take_along_axis(logp, tc[:, None], axis=1)[:, 0]
    return jnp.sum(jnp.where(fvalid, nll, 0.0)) / jnp.sum(fvalid)


if __name__ == "__main__":
    key = jax.random.PRNGKey(0)
    k1, k2, k3 = jax.random.split(key, 3)

    # Small shapes consistent with a segmentation head: N=2, C=4, H=W=16.
    pred = jax.random.normal(k1, (2, 4, 16, 16), dtype=jnp.float32)
    aux_pred = jax.random.normal(k3, (2, 4, 16, 16), dtype=jnp.float32)
    # Labels in [-1, 3]: -1 == ignore_index.
    target = jax.random.randint(k2, (2, 16, 16), -1, 4).astype(jnp.int32)

    # Default module config (min_kept=100000 > num_valid -> plain ignored CE).
    out_default = mix_softmax_ce_ohem_loss((pred,), target)
    loss_default = jax.block_until_ready(out_default["loss"])

    # OHEM hard-mining path (min_kept < num_valid).
    out_ohem = mix_softmax_ce_ohem_loss((pred,), target, min_kept=64)
    loss_ohem = jax.block_until_ready(out_ohem["loss"])

    # Aux (multi-head) path.
    out_aux = mix_softmax_ce_ohem_loss((pred, aux_pred), target, aux=True,
                                       min_kept=64)
    loss_aux = jax.block_until_ready(out_aux["loss"])

    ref_default = _ref_ohem_loss(pred, target)
    ref_ohem = _ref_ohem_loss(pred, target, min_kept=64)
    ref_aux = ref_ohem + 0.4 * _ref_ohem_loss(aux_pred, target, min_kept=64)

    assert jnp.isfinite(loss_default) and jnp.isfinite(loss_ohem)
    assert jnp.isfinite(loss_aux)
    assert jnp.allclose(loss_default, ref_default, rtol=1e-3, atol=1e-4)
    assert jnp.allclose(loss_ohem, ref_ohem, rtol=1e-3, atol=1e-4)
    assert jnp.allclose(loss_aux, ref_aux, rtol=1e-3, atol=1e-4)

    print("KERNEL_OK")
</pallas_src>

<mosaic_0001>
module attributes {stable_mosaic.version = 11 : i64} {
  func.func @_ohem_nll_kernel(%arg0: i32, %arg1: i32, %arg2: memref<1x4x1x256xf32, #tpu.memory_space<vmem>>, %arg3: memref<1x1x256xi32, #tpu.memory_space<vmem>>, %arg4: memref<1x1x256xf32, #tpu.memory_space<vmem>>) attributes {dimension_semantics = [#tpu.dimension_semantics<parallel>, #tpu.dimension_semantics<parallel>], iteration_bounds = array<i64: 1, 2>, scalar_prefetch = 0 : i64, scratch_operands = 0 : i64, tpu.core_type = #tpu.core_type<tc>, window_params = [{transform_indices = @transform_0, window_bounds = array<i64: 1, 4, 1, 256>}, {transform_indices = @transform_1, window_bounds = array<i64: 1, 1, 256>}, {transform_indices = @transform_2, window_bounds = array<i64: 1, 1, 256>}]} {
    %c0 = arith.constant 0 : index
    %c0_0 = arith.constant 0 : index
    %c0_1 = arith.constant 0 : index
    %0 = vector.load %arg3[%c0, %c0_0, %c0_1] : memref<1x1x256xi32, #tpu.memory_space<vmem>>, vector<1x1x256xi32>
    %1 = vector.shape_cast %0 : vector<1x1x256xi32> to vector<1x256xi32>
    %c-1_i32 = arith.constant -1 : i32
    %2 = vector.broadcast %c-1_i32 : i32 to vector<1x256xi32>
    %3 = arith.cmpi ne, %1, %2 : vector<1x256xi32>
    %c0_i32 = arith.constant 0 : i32
    %4 = vector.broadcast %c0_i32 : i32 to vector<1x256xi32>
    %5 = arith.select %3, %1, %4 : vector<1x256xi1>, vector<1x256xi32>
    %c0_2 = arith.constant 0 : index
    %c0_3 = arith.constant 0 : index
    %c0_4 = arith.constant 0 : index
    %c0_5 = arith.constant 0 : index
    %6 = vector.load %arg2[%c0_2, %c0_3, %c0_4, %c0_5] : memref<1x4x1x256xf32, #tpu.memory_space<vmem>>, vector<1x1x1x256xf32>
    %7 = vector.shape_cast %6 : vector<1x1x1x256xf32> to vector<1x256xf32>
    %c0_6 = arith.constant 0 : index
    %c1 = arith.constant 1 : index
    %c0_7 = arith.constant 0 : index
    %c0_8 = arith.constant 0 : index
    %8 = vector.load %arg2[%c0_6, %c1, %c0_7, %c0_8] : memref<1x4x1x256xf32, #tpu.memory_space<vmem>>, vector<1x1x1x256xf32>
    %9 = vector.shape_cast %8 : vector<1x1x1x256xf32> to vector<1x256xf32>
    %10 = arith.maximumf %7, %9 : vector<1x256xf32>
    %c0_9 = arith.constant 0 : index
    %c2 = arith.constant 2 : index
    %c0_10 = arith.constant 0 : index
    %c0_11 = arith.constant 0 : index
    %11 = vector.load %arg2[%c0_9, %c2, %c0_10, %c0_11] : memref<1x4x1x256xf32, #tpu.memory_space<vmem>>, vector<1x1x1x256xf32>
    %12 = vector.shape_cast %11 : vector<1x1x1x256xf32> to vector<1x256xf32>
    %13 = arith.maximumf %10, %12 : vector<1x256xf32>
    %c0_12 = arith.constant 0 : index
    %c3 = arith.constant 3 : index
    %c0_13 = arith.constant 0 : index
    %c0_14 = arith.constant 0 : index
    %14 = vector.load %arg2[%c0_12, %c3, %c0_13, %c0_14] : memref<1x4x1x256xf32, #tpu.memory_space<vmem>>, vector<1x1x1x256xf32>
    %15 = vector.shape_cast %14 : vector<1x1x1x256xf32> to vector<1x256xf32>
    %16 = arith.maximumf %13, %15 : vector<1x256xf32>
    %cst = arith.constant 0.000000e+00 : f32
    %17 = vector.broadcast %cst : f32 to vector<1x256xf32>
    %cst_15 = arith.constant 0.000000e+00 : f32
    %18 = vector.broadcast %cst_15 : f32 to vector<1x256xf32>
    %c0_16 = arith.constant 0 : index
    %c0_17 = arith.constant 0 : index
    %c0_18 = arith.constant 0 : index
    %c0_19 = arith.constant 0 : index
    %19 = vector.load %arg2[%c0_16, %c0_17, %c0_18, %c0_19] : memref<1x4x1x256xf32, #tpu.memory_space<vmem>>, vector<1x1x1x256xf32>
    %20 = vector.shape_cast %19 : vector<1x1x1x256xf32> to vector<1x256xf32>
    %21 = arith.subf %20, %16 : vector<1x256xf32>
    %22 = math.exp %21 : vector<1x256xf32>
    %23 = arith.addf %17, %22 : vector<1x256xf32>
    %c0_i32_20 = arith.constant 0 : i32
    %24 = vector.broadcast %c0_i32_20 : i32 to vector<1x256xi32>
    %25 = arith.cmpi eq, %5, %24 : vector<1x256xi32>
    %26 = arith.select %25, %20, %18 : vector<1x256xi1>, vector<1x256xf32>
    %c0_21 = arith.constant 0 : index
    %c1_22 = arith.constant 1 : index
    %c0_23 = arith.constant 0 : index
    %c0_24 = arith.constant 0 : index
    %27 = vector.load %arg2[%c0_21, %c1_22, %c0_23, %c0_24] : memref<1x4x1x256xf32, #tpu.memory_space<vmem>>, vector<1x1x1x256xf32>
    %28 = vector.shape_cast %27 : vector<1x1x1x256xf32> to vector<1x256xf32>
    %29 = arith.subf %28, %16 : vector<1x256xf32>
    %30 = math.exp %29 : vector<1x256xf32>
    %31 = arith.addf %23, %30 : vector<1x256xf32>
    %c1_i32 = arith.constant 1 : i32
    %32 = vector.broadcast %c1_i32 : i32 to vector<1x256xi32>
    %33 = arith.cmpi eq, %5, %32 : vector<1x256xi32>
    %34 = arith.select %33, %28, %26 : vector<1x256xi1>, vector<1x256xf32>
    %c0_25 = arith.constant 0 : index
    %c2_26 = arith.constant 2 : index
    %c0_27 = arith.constant 0 : index
    %c0_28 = arith.constant 0 : index
    %35 = vector.load %arg2[%c0_25, %c2_26, %c0_27, %c0_28] : memref<1x4x1x256xf32, #tpu.memory_space<vmem>>, vector<1x1x1x256xf32>
    %36 = vector.shape_cast %35 : vector<1x1x1x256xf32> to vector<1x256xf32>
    %37 = arith.subf %36, %16 : vector<1x256xf32>
    %38 = math.exp %37 : vector<1x256xf32>
    %39 = arith.addf %31, %38 : vector<1x256xf32>
    %c2_i32 = arith.constant 2 : i32
    %40 = vector.broadcast %c2_i32 : i32 to vector<1x256xi32>
    %41 = arith.cmpi eq, %5, %40 : vector<1x256xi32>
    %42 = arith.select %41, %36, %34 : vector<1x256xi1>, vector<1x256xf32>
    %c0_29 = arith.constant 0 : index
    %c3_30 = arith.constant 3 : index
    %c0_31 = arith.constant 0 : index
    %c0_32 = arith.constant 0 : index
    %43 = vector.load %arg2[%c0_29, %c3_30, %c0_31, %c0_32] : memref<1x4x1x256xf32, #tpu.memory_space<vmem>>, vector<1x1x1x256xf32>
    %44 = vector.shape_cast %43 : vector<1x1x1x256xf32> to vector<1x256xf32>
    %45 = arith.subf %44, %16 : vector<1x256xf32>
    %46 = math.exp %45 : vector<1x256xf32>
    %47 = arith.addf %39, %46 : vector<1x256xf32>
    %c3_i32 = arith.constant 3 : i32
    %48 = vector.broadcast %c3_i32 : i32 to vector<1x256xi32>
    %49 = arith.cmpi eq, %5, %48 : vector<1x256xi32>
    %50 = arith.select %49, %44, %42 : vector<1x256xi1>, vector<1x256xf32>
    %51 = math.log %47 : vector<1x256xf32>
    %52 = arith.addf %51, %16 : vector<1x256xf32>
    %53 = arith.subf %52, %50 : vector<1x256xf32>
    %cst_33 = arith.constant 0.000000e+00 : f32
    %54 = vector.broadcast %cst_33 : f32 to vector<1x256xf32>
    %55 = arith.select %3, %53, %54 : vector<1x256xi1>, vector<1x256xf32>
    %c0_34 = arith.constant 0 : index
    %c0_35 = arith.constant 0 : index
    %c0_36 = arith.constant 0 : index
    %56 = vector.load %arg4[%c0_34, %c0_35, %c0_36] : memref<1x1x256xf32, #tpu.memory_space<vmem>>, vector<1x1x256xf32>
    %57 = vector.shape_cast %56 : vector<1x1x256xf32> to vector<1x256xf32>
    %58 = vector.shape_cast %55 : vector<1x256xf32> to vector<1x1x256xf32>
    tpu.vector_store %arg4[%c0_34, %c0_35, %c0_36], %58 {strides = array<i32>} : memref<1x1x256xf32, #tpu.memory_space<vmem>>, vector<1x1x256xf32>,
    return
  }
  func.func @transform_0(%arg0: i32, %arg1: i32) -> (i32, i32, i32, i32) {
    %c0_i32 = arith.constant 0 : i32
    %c0_i32_0 = arith.constant 0 : i32
    %c0_i32_1 = arith.constant 0 : i32
    return %arg1, %c0_i32, %arg0, %c0_i32_0 : i32, i32, i32, i32
  }
  func.func @transform_1(%arg0: i32, %arg1: i32) -> (i32, i32, i32) {
    %c0_i32 = arith.constant 0 : i32
    %c0_i32_0 = arith.constant 0 : i32
    return %arg1, %arg0, %c0_i32 : i32, i32, i32
  }
  func.func @transform_2(%arg0: i32, %arg1: i32) -> (i32, i32, i32) {
    %c0_i32 = arith.constant 0 : i32
    %c0_i32_0 = arith.constant 0 : i32
    return %arg1, %arg0, %c0_i32 : i32, i32, i32
  }
}

</mosaic_0001>

<bundles_post_ra>
// kernel: tpu_custom_call.1
= control target key start
LH: loop header
LB: loop body
LE: loop exit
PB: predicated region body
PF: predicated region fallthrough
CT: control target
= control target key end

     0   :  { %7 = vsyncpa [#allocation3], 0  ;;  %s836_s0 = inlined_call_operand.hbm [shape: f32[2,4,1,256], index: 0, kind: input, shape index: {}]   ;;  %s837_s1 = inlined_call_operand.hbm [shape: s32[2,1,256], index: 1, kind: input, shape index: {}]   ;;  %s838_s2 = inlined_call_operand.hbm [shape: f32[2,1,256], index: 2, kind: output, shape index: {}]  }
   0x1   :  { %9 = vsyncpa [#allocation3 + $0x1], 0 }
   0x2   :  { %10 = vsyncpa [#allocation6], 0 }
   0x3   :  { %12 = vsyncpa [#allocation6 + $0x1], 0 }
   0x4   :  { %13 = vsyncpa [#allocation4], 0 }
   0x5   :  { %15 = vsyncpa [#allocation4 + $0x1], 0  ;;  %s662_s9 = smov 0   ;;  %s664_s10 = smov 0  }
   0x6   :  { %s666_s11 = smov 0   ;;  %s668_s12 = smov 0  }
   0x7   :  { %s670_s13 = smov 0   ;;  %s672_s14 = smov 0  }
   0x8 LB: > { %s396_s15 = sadd.s32 4294967295, %s640_s14   ;;  %s397_s16 = sadd.s32 4294967294, %s640_s14   ;;  %s640_s14 = sphi %s672_s14, %s21_s14   ;;  %s636_s13 = sphi %s670_s13, %s850_s13   ;;  %s632_s12 = sphi %s668_s12, %s849_s12   ;;  %s628_s11 = sphi %s666_s11, %s848_s11   ;;  %s624_s10 = sphi %s664_s10, %s847_s10   ;;  %s620_s9 = sphi %s662_s9, %s846_s9  }
   0x9   : > { %s30_s17 = sadd.s32 1, %s636_s13  ;;  %s42_s18 = sadd.s32 1, %s628_s11 }
   0xa   : > { %p31_p0 = scmp.ge.s32.totalorder %s30_s17, 2  ;;  %p49_p1 = scmp.ne.s32.totalorder %s628_s11, %s624_s10 }
   0xb   : > { %p50_p2 = scmp.eq.s32.totalorder %s640_s14, 0  ;;  %p55_p3 = scmp.ne.s32.totalorder %s624_s10, %s620_s9 }
   0xc   : > { %s852_s17 = smov (%p31_p0, %s30_s17), 0  ;;  %p56_p5 = scmp.eq.s32.totalorder %s396_s15, 0 }
   0xd   : > { %p703_p4 = por %p50_p2, %p49_p1  ;;  %s37_s20 = ssub.s32 %s636_s13, %s852_s17 }
   0xe   : > { %p109_p6 = scmp.eq.s32.totalorder %s396_s15, 1  ;;  %p40_p7 = scmp.eq.s32.totalorder %s37_s20, 0 }
   0xf   : > { %p709_p8 = por %p56_p5, %p55_p3  ;;  %p115_p10 = scmp.eq.s32.totalorder %s397_s16, 1 }
  0x10   : > { %p713_p9 = por %p109_p6, %p49_p1  ;;  %p438_p13 = scmp.lt.s32.totalorder %s640_s14, 2 }
  0x11   : > { %s718_s23 = scalar_select %p40_p7, %s628_s11, %s42_s18  }
  0x12   : > { %p720_p11 = por %p115_p10, %p55_p3  ;;  %s727_s25 = sand.u32 1, %s628_s11  }
  0x13   : > { %s400_s26 = sshll.u32 %s727_s25, 3  ;;  %s418_s27 = sshll.u32 %s636_s13, 7 }
  0x14   : > { %s147_s30 = scalar_lea.hbm %s836_s0, %s418_s27  ;;  %s139_s3 = scalar_lea.vmem [#allocation2], %s400_s26 }
  0x15   : > { %s148_s4 = sshll.u32 %s139_s3, 4  ;;  %p736_p0 = pnand %p438_p13, %p703_p4  ;;  %s149_s4 = int_to_ptr.vmem [resolvable:$true] %s148_s4 }
  0x16   : > { %p406_p1 = scmp.ge.s32.totalorder %s640_s14, 1  ;;  %s136_s6 = scalar_lea.sflag [#allocation3], %s727_s25 }
  0x17   : > { %p502_p2 = pneg %p736_p0  ;;  %s513_s7 = scalar_lea.vmem %s149_s4, 128 }
  0x18   : > { %p514_p3 = scmp.ne.s32.totalorder %s149_s4, %s513_s7  ;;  %s642_s8 = smov [#allocation2]  }
  0x19   : > { %s518_s15 = sshll.u32 %s642_s8, 4  ;;  %s519_s15 = int_to_ptr.vmem [resolvable:$false] %s518_s15 }
  0x1a   : > { %p516_p5 = pnand %p514_p3, %p502_p2  ;;  %s520_s16 = scalar_lea.vmem %s519_s15, 256 }
  0x1b   : > { %p521_p4 = scmp.lt.s32.totalorder %s149_s4, %s519_s15  ;;  %p522_p7 = scmp.lt.s32.totalorder %s520_s16, %s513_s7 }
  0x1c   : > { %p517_p6 = pneg %p516_p5 }
  0x1d   : > { %p523_p10 = por %p522_p7, %p521_p4 }
  0x1f   : > { %p524_p13 = pnand %p523_p10, %p517_p6 }
  0x21   : > { %527 = shalt.err (!%p524_p13)
}
  0x22   : > { %s643_s18 = smov 32   ;;  %s644_s19 = smov 2  }
  0x23   : > { %430 = dma.hbm_to_vmem [thread:$0]  (!%p736_p0), %s147_s30, 128, %s149_s4, %s136_s6, %s643_s18, %s643_s18, %s644_s19  }
  0x24   : > { %p177_p3 = scmp.lt.s32.totalorder %s640_s14, 3  ;;  %s403_s20 = sshll.u32 %s727_s25, 1 }
  0x25   : > { %s419_s26 = sshll.u32 %s636_s13, 5  ;;  %s162_s7 = scalar_lea.vmem [#allocation5], %s403_s20 }
  0x26   : > { %p754_p5 = pnand %p406_p1, %p177_p3  ;;  %s170_s3 = scalar_lea.hbm %s837_s1, %s419_s26 }
  0x27   : > { %s172_s8 = sshll.u32 %s162_s7, 4  ;;  %s159_s15 = scalar_lea.sflag [#allocation6], %s727_s25  ;;  %s173_s8 = int_to_ptr.vmem [resolvable:$true] %s172_s8 }
  0x28   : > { %s541_s16 = scalar_lea.vmem %s173_s8, 32  ;;  %s645_s30 = smov [#allocation5]  }
  0x29   : > { %p542_p6 = scmp.ne.s32.totalorder %s173_s8, %s541_s16  ;;  %s546_s4 = sshll.u32 %s645_s30, 4  ;;  %s547_s4 = int_to_ptr.vmem [resolvable:$false] %s546_s4 }
  0x2a   : > { %s548_s6 = scalar_lea.vmem %s547_s4, 64  ;;  %p549_p1 = scmp.lt.s32.totalorder %s173_s8, %s547_s4 }
  0x2b   : > { %p544_p4 = pnand %p542_p6, %p502_p2  ;;  %p550_p10 = scmp.lt.s32.totalorder %s548_s6, %s541_s16 }
  0x2d   : > { %p545_p7 = pneg %p544_p4  ;;  %p551_p13 = por %p550_p10, %p549_p1 }
  0x2f   : > { %p552_p3 = pnand %p551_p13, %p545_p7 }
  0x31   : > { %555 = shalt.err (!%p552_p3)
}
  0x32   : > { %433 = dma.hbm_to_vmem [thread:$0]  (!%p736_p0), %s170_s3, 32, %s173_s8, %s159_s15  }
  0x33   : > { %181 = sbr.rel (%p754_p5) target bundleno = 126 (0x7e), region = 28  ;;  %s770_s25 = sand.u32 (!%p754_p5), 1, %s624_s10  }
  0x34   : > { %s407_s18 = sshll.u32 (!%p754_p5), %s770_s25, 3  ;;  %s184_s19 = scalar_lea.sflag (!%p754_p5), [#allocation3], %s770_s25 }
  0x35   : > { %s187_s20 = scalar_lea.vmem (!%p754_p5), [#allocation2], %s407_s18 }
  0x38   : > { %607 = dma.done.wait (%p709_p8), %s184_s19, 128  }
  0x39   : > { %609 = vsyncadd (%p709_p8), %s184_s19, 4294967168  ;;  %s408_s5 = sshll.u32 %s770_s25, 1  ;;  %s193_s26 = scalar_lea.sflag [#allocation6], %s770_s25 }
  0x3a   : > { %s196_s27 = scalar_lea.vmem [#allocation5], %s408_s5 }
  0x3b   : > { %611 = dma.done.wait (%p709_p8), %s193_s26, 32  }
  0x3c   : > { %613 = vsyncadd (%p709_p8), %s193_s26, 4294967264  ;;  %v225_v0 = vld [vmem:[%s187_s20] sm:$0x3]  ;;  %v410_v1 = vld [vmem:[%s187_s20 + $0x2] sm:$0x3]  ;;  %v264_v29 = vlaneseq  ;;  %s221_s21 = scalar_lea.vmem [#allocation7], %s408_s5 }
  0x3d   : > { %v228_v2 = vmax.f32 %v225_v0, %v410_v1  ;;  %v411_v3 = vld [vmem:[%s187_s20 + $0x4] sm:$0x3]  ;;  %v412_v4 = vld [vmem:[%s187_s20 + $0x6] sm:$0x3]  ;;  %v222_v18 = vld [vmem:[%s196_s27] sm:$0x3] }
  0x3e   : > { %vm223_vm0 = vcmp.ne.s32.totalorder %v222_v18, 4294967295  ;;  %s286_s28 = sshll.u32 %s221_s21, 4  ;;  %s420_s29 = sshll.u32 %s632_s12, 5  ;;  %vm266_vm5 = vcmp.lt.s32.totalorder %v264_v29, 256  ;;  %s790_s28 = int_to_ptr.vmem [resolvable:$true] %s286_s28 }
  0x3f   : > { %v231_v5 = vmax.f32 %v228_v2, %v411_v3  ;;  %v224_v23 = vsel %vm223_vm0, %v222_v18, 0  ;;  %s284_s8 = scalar_lea.hbm %s838_s2, %s420_s29  ;;  %s270_s15 = scalar_lea.sflag [#allocation4], %s770_s25 }
  0x40   : > { %vm239_vm1 = vcmp.eq.s32.totalorder %v224_v23, 0  ;;  %vm245_vm2 = vcmp.eq.s32.totalorder %v224_v23, 1  ;;  %vm251_vm3 = vcmp.eq.s32.totalorder %v224_v23, 2  ;;  %vm257_vm4 = vcmp.eq.s32.totalorder %v224_v23, 3  ;;  %s556_s16 = scalar_lea.vmem %s790_s28, 32  ;;  %s646_s12 = smov [#allocation7]  }
  0x41   : > { %v234_v6 = vmax.f32 %v231_v5, %v412_v4  ;;  %v240_v24 = vsel %vm239_vm1, %v225_v0, 0.0  ;;  %p557_p8 = scmp.ne.s32.totalorder %s790_s28, %s556_s16  ;;  %s560_s30 = sshll.u32 %s646_s12, 4  ;;  %s561_s30 = int_to_ptr.vmem [resolvable:$false] %s560_s30 }
  0x42   : > { %v246_v25 = vsel %vm245_vm2, %v410_v1, %v240_v24  ;;  %s562_s4 = scalar_lea.vmem %s561_s30, 64  ;;  %p563_p5 = scmp.lt.s32.totalorder %s790_s28, %s561_s30 }
  0x43   : > { %v235_v7 = vsub.f32 %v225_v0, %v234_v6  ;;  %v241_v8 = vsub.f32 %v410_v1, %v234_v6  ;;  %v247_v9 = vsub.f32 %v411_v3, %v234_v6  ;;  %v253_v10 = vsub.f32 %v412_v4, %v234_v6  ;;  %p558_p0 = pnand %p557_p8, %p713_p9  ;;  %p564_p6 = scmp.lt.s32.totalorder %s562_s4, %s556_s16 }
  0x44   : > { %v252_v26 = vsel %vm251_vm3, %v411_v3, %v246_v25 }
  0x45   : > { %v236_v11 = vmul.f32 1.442695, %v235_v7  ;;  %v242_v12 = vmul.f32 1.442695, %v241_v8  ;;  %v248_v13 = vmul.f32 1.442695, %v247_v9  ;;  %v258_v30 = vsel %vm257_vm4, %v412_v4, %v252_v26  ;;  %p559_p2 = pneg %p558_p0  ;;  %p565_p4 = por %p564_p6, %p563_p5 }
  0x46   : > { %v254_v14 = vmul.f32 1.442695, %v253_v10 }
  0x47   : > { %490 = vpow2.f32 %v236_v11  ;;  %p566_p7 = pnand %p565_p4, %p559_p2 }
  0x48   : > { %492 = vpow2.f32 %v242_v12 }
  0x49   : > { %494 = vpow2.f32 %v248_v13 }
  0x4a   : > { %496 = vpow2.f32 %v254_v14 }
  0x54   : > { %v491_v15 = vpop.eup %490 }
  0x55   : > { %v493_v16 = vpop.eup %492 }
  0x56   : > { %v495_v17 = vpop.eup %494  ;;  %v244_v19 = vadd.f32 %v493_v16, %v491_v15 }
  0x57   : > { %v497_v20 = vpop.eup %496 }
  0x58   : > { %v250_v21 = vadd.f32 %v495_v17, %v244_v19 }
  0x5a   : > { %v256_v22 = vadd.f32 %v497_v20, %v250_v21 }
  0x5c   : > { %498 = vlog2.f32 %v256_v22 }
  0x69   : > { %v499_v27 = vpop.eup %498 }
  0x6a   : > { %v260_v28 = vmul.f32 0.6931472, %v499_v27 }
  0x6c   : > { %v261_v31 = vadd.f32 %v260_v28, %v234_v6 }
  0x6e   : > { %v262_v32 = vsub.f32 %v261_v31, %v258_v30 }
  0x70   : > { %v263_v33 = vsel %vm223_vm0, %v262_v32, 0.0 }
  0x71   : > { %268 = vst.msk [vmem:[%s221_s21] sm:$0x3] %vm266_vm5, %v263_v33 }
  0x72   : > { %569 = shalt.err (!%p566_p7)
}
  0x73   : > { %s570_s6 = scalar_lea.hbm %s284_s8, 32  ;;  %s574_s19 = scalar_lea.hbm %s838_s2, 64 }
  0x74   : > { %p571_p1 = scmp.ne.s32.totalorder %s284_s8, %s570_s6  ;;  %p575_p3 = scmp.lt.s32.totalorder %s284_s8, %s838_s2 }
  0x75   : > { %p576_p8 = scmp.lt.s32.totalorder %s574_s19, %s570_s6 }
  0x76   : > { %p572_p10 = pnand %p571_p1, %p713_p9 }
  0x77   : > { %p577_p0 = por %p576_p8, %p575_p3 }
  0x78   : > { %p573_p13 = pneg %p572_p10 }
  0x7a   : > { %p578_p12 = pnand %p577_p0, %p573_p13 }
  0x7c   : > { %581 = shalt.err (!%p578_p12)
}
  0x7d   : > { %425 = dma.vmem_to_hbm [thread:$0]  (%p713_p9), %s790_s28, 32, %s284_s8, %s270_s15  }
  0x7e PF: > { %s298_s26 = sand.u32 1, %s620_s9   ;;  %p845_p2 = scmp.ge.s32.totalorder %s640_s14, 2 }
  0x7f   : > { %s299_s27 = scalar_lea.sflag [#allocation4], %s298_s26 }
  0x80   : > { %p435_p5 = pnand %p845_p2, %p720_p11 }
  0x82   : > { %p436_p6 = pneg %p435_p5 }
  0x84   : > { %615 = dma.done.wait (%p436_p6), %s299_s27, 32  }
  0x85   : > { %617 = vsyncadd (%p436_p6), %s299_s27, 4294967264  ;;  %s21_s14 = sadd.s32 1, %s640_s14   ;;  %s846_s9 = smov %s624_s10 }
  0x86   : > { %p18_p4 = scmp.ge.s32.totalorder %s21_s14, 4   ;;  %s847_s10 = smov %s628_s11 }
  0x87   : > { %s848_s11 = smov %s718_s23  ;;  %s849_s12 = smov %s636_s13 }
  0x88   : > { %s850_s13 = smov %s852_s17  ;;  %20 = sbr.rel (!%p18_p4) target bundleno = 8 (0x8), region = 89 }
  0x8d   :  { %304 = vsyncpa [#allocation3], 1 }
  0x8e   :  { %306 = vsyncpa [#allocation3 + $0x1], 1 }
  0x8f   :  { %307 = vsyncpa [#allocation6], 1 }
  0x90   :  { %309 = vsyncpa [#allocation6 + $0x1], 1 }
  0x91   :  { %310 = vsyncpa [#allocation4], 1 }
  0x92   :  { %312 = vsyncpa [#allocation4 + $0x1], 1 }

</bundles_post_ra>
